<compile_context>
chip_gen: v5e
topology: v5e:2x2
jax: 0.10.0
libtpu: 0.0.40
codegen_flags: <defaults>
</compile_context>

<pallas_src>
import jax
import jax.numpy as jnp
from jax import lax
from jax.experimental import pallas as pl
from jax.experimental.pallas import tpu as pltpu


def _round_up(v, m):
    return (v + m - 1) // m * m


def _largest_divisor_leq(n, cap):
    cap = max(1, min(n, cap))
    for d in range(cap, 0, -1):
        if n % d == 0:
            return d
    return 1


# -----------------------------------------------------------------------------
# Fused single-pass kernel: the whole (bb, C, N) slab is VMEM-resident, so
# energy -> softmax -> output happen in one body and attention never hits HBM.
# gamma is folded into attention (C*C multiplies instead of C*N).
# -----------------------------------------------------------------------------
def cam_fused_kernel(gamma_ref, x_ref, o_ref):
    x = x_ref[...]                                        # (bb, C, N), native dtype
    energy = lax.dot_general(
        x, x, dimension_numbers=(((2,), (2,)), ((0,), (0,))),
        preferred_element_type=jnp.float32)               # (bb, C, C) f32
    # torch: softmax(rowmax(e) - e).  Softmax is shift-invariant per row, so a
    # single stable shift by the row min suffices: exp(min - e).
    shifted = jnp.min(energy, axis=-1, keepdims=True) - energy
    e = jnp.exp(shifted)
    attn = e / jnp.sum(e, axis=-1, keepdims=True)         # exact divide (runs once)
    attn = (gamma_ref[0] * attn).astype(x.dtype)          # fold gamma into attention
    out = lax.dot_general(
        attn, x, dimension_numbers=(((2,), (1,)), ((0,), (0,))),
        preferred_element_type=jnp.float32)               # (bb, C, N) f32
    if o_ref.dtype == jnp.float32:
        o_ref[...] = out + x
    else:
        # bf16 epilogue add (2 elems / vreg row on v6e/v7x; avoids x upcast).
        o_ref[...] = out.astype(o_ref.dtype) + x


# -----------------------------------------------------------------------------
# Two-pass path for large C*N.
# Pass 1: accumulate the channel gram matrix over lane-dense N tiles into an
# f32 VMEM scratch (reduction axis last, "arbitrary"), then one min-shifted
# softmax and fold gamma into the stored attention.
# -----------------------------------------------------------------------------
def cam_attn_kernel(gamma_ref, x_ref, attn_ref, acc_ref):
    n = pl.program_id(1)

    @pl.when(n == 0)
    def _():
        acc_ref[...] = jnp.zeros_like(acc_ref)

    x = x_ref[...]                                        # (bb, C, tn)
    acc_ref[...] += lax.dot_general(
        x, x, dimension_numbers=(((2,), (2,)), ((0,), (0,))),
        preferred_element_type=jnp.float32)               # (bb, C, C) f32

    @pl.when(n == pl.num_programs(1) - 1)
    def _():
        energy = acc_ref[...]
        shifted = jnp.min(energy, axis=-1, keepdims=True) - energy
        e = jnp.exp(shifted)
        attn = e / jnp.sum(e, axis=-1, keepdims=True)     # exact divide
        attn_ref[...] = (gamma_ref[0] * attn).astype(attn_ref.dtype)


# Pass 2: out = (gamma * attention) @ x + x, fully parallel over (b, n).
def cam_out_kernel(attn_ref, x_ref, o_ref):
    x = x_ref[...]                                        # (bb, C, tn)
    out = lax.dot_general(
        attn_ref[...], x, dimension_numbers=(((2,), (1,)), ((0,), (0,))),
        preferred_element_type=jnp.float32)               # (bb, C, tn) f32
    if o_ref.dtype == jnp.float32:
        o_ref[...] = out + x
    else:
        o_ref[...] = out.astype(o_ref.dtype) + x


_FUSED_SLAB_BYTES = 2 << 20      # per-batch-element x slab small enough -> fuse
_TARGET_BLOCK_BYTES = 2 << 20    # ~2 MiB per x block hides step overhead (v7x HBM)


@jax.jit
def cam_module_forward(x, gamma):
    """x: (B, C, H, W); gamma: (1,)-shaped float32 (the module parameter)."""
    B, C, H, W = x.shape
    N = H * W
    itemsize = jnp.dtype(x.dtype).itemsize
    gamma = jnp.asarray(gamma, jnp.float32).reshape((1,))
    x_flat = x.reshape(B, C, N)

    slab_bytes = C * N * itemsize

    # ------------------------- fused single-pass path -------------------------
    if slab_bytes <= _FUSED_SLAB_BYTES and C * C * 4 <= (1 << 20):
        bb_cap = max(1, min(B, _TARGET_BLOCK_BYTES // max(1, slab_bytes)))
        if B >= 2:                       # keep grid_b >= 2 so both v7x TCs get work
            bb_cap = min(bb_cap, max(1, B // 2))
        bb = _largest_divisor_leq(B, bb_cap)   # bb divides B -> exact blocks only
        grid_b = B // bb

        out_flat = pl.pallas_call(
            cam_fused_kernel,
            out_shape=jax.ShapeDtypeStruct((B, C, N), x.dtype),
            grid_spec=pltpu.PrefetchScalarGridSpec(
                num_scalar_prefetch=0,
                grid=(grid_b,),
                in_specs=[
                    pl.BlockSpec(memory_space=pltpu.MemorySpace.SMEM),    # gamma
                    pl.BlockSpec((bb, C, N), lambda b: (b, 0, 0)),        # x
                ],
                out_specs=pl.BlockSpec((bb, C, N), lambda b: (b, 0, 0)),
            ),
            compiler_params=pltpu.CompilerParams(
                dimension_semantics=("parallel",)),
        )(gamma, x_flat)
        return out_flat.reshape(B, C, H, W)

    # --------------------------- two-pass fallback ---------------------------
    # Pad N only up to a small lane-dense base (zero columns add nothing to the
    # gram matrix) and pick tn as a divisor of the padded N: no pad-to-tile
    # blow-up and every block store is lane-dense.
    base = 512 if N >= 512 else 128
    n_pad = _round_up(N, base)
    tn_max = 1024 if C >= 1024 else 2048           # smaller tiles for huge C (VMEM)
    tn = base * _largest_divisor_leq(n_pad // base, max(1, tn_max // base))

    block_bytes = C * tn * itemsize
    bb_cap = max(1, min(B, _TARGET_BLOCK_BYTES // max(1, block_bytes)))
    if B >= 2:
        bb_cap = min(bb_cap, max(1, B // 2))
    bb = _largest_divisor_leq(B, bb_cap)

    def _pass1_bytes(tn_):
        # 2x x blocks (double buffer) + 2x attention out blocks + f32 accumulator
        return (2 * bb * C * tn_ + 2 * bb * C * C) * itemsize + bb * C * C * 4

    # Shrink tn (staying a divisor of n_pad) if the pass-1 working set is large.
    while tn > base and _pass1_bytes(tn) > (40 << 20):
        new_tn = base * _largest_divisor_leq(n_pad // base, max(1, tn // base - 1))
        if new_tn >= tn:
            break
        tn = new_tn

    pass2_bytes = (2 * bb * C * C + 4 * bb * C * tn) * itemsize
    vmem_limit = int(min(100 << 20,
                         max(32 << 20,
                             max(_pass1_bytes(tn), pass2_bytes) + (8 << 20))))

    if n_pad != N:
        # TODO(synk): replace the wrapper pad/slice with an in-kernel iota mask of
        # the ragged tail tile to save one extra HBM pass over x / out.
        x_flat = jnp.pad(x_flat, ((0, 0), (0, 0), (0, n_pad - N)))

    grid_b = B // bb
    grid_n = n_pad // tn

    attention = pl.pallas_call(
        cam_attn_kernel,
        out_shape=jax.ShapeDtypeStruct((B, C, C), x.dtype),
        grid_spec=pltpu.PrefetchScalarGridSpec(
            num_scalar_prefetch=0,
            grid=(grid_b, grid_n),
            in_specs=[
                pl.BlockSpec(memory_space=pltpu.MemorySpace.SMEM),        # gamma
                pl.BlockSpec((bb, C, tn), lambda b, n: (b, 0, n)),        # x
            ],
            out_specs=pl.BlockSpec((bb, C, C), lambda b, n: (b, 0, 0)),
            scratch_shapes=[pltpu.VMEM((bb, C, C), jnp.float32)],
        ),
        compiler_params=pltpu.CompilerParams(
            dimension_semantics=("parallel", "arbitrary"),
            vmem_limit_bytes=vmem_limit),
    )(gamma, x_flat)

    out_flat = pl.pallas_call(
        cam_out_kernel,
        out_shape=jax.ShapeDtypeStruct((B, C, n_pad), x.dtype),
        grid_spec=pltpu.PrefetchScalarGridSpec(
            num_scalar_prefetch=0,
            grid=(grid_b, grid_n),
            in_specs=[
                pl.BlockSpec((bb, C, C), lambda b, n: (b, 0, 0)),         # attn
                pl.BlockSpec((bb, C, tn), lambda b, n: (b, 0, n)),        # x
            ],
            out_specs=pl.BlockSpec((bb, C, tn), lambda b, n: (b, 0, n)),
        ),
        compiler_params=pltpu.CompilerParams(
            dimension_semantics=("parallel", "parallel"),
            vmem_limit_bytes=vmem_limit),
    )(attention, x_flat)

    if n_pad != N:
        out_flat = out_flat[:, :, :N]
    return out_flat.reshape(B, C, H, W)


def cam_module_reference(x, gamma):
    """Pure-JAX reference matching the PyTorch forward exactly."""
    B, C, H, W = x.shape
    xf = x.reshape(B, C, H * W).astype(jnp.float32)
    energy = jnp.einsum("bcn,bdn->bcd", xf, xf, precision=lax.Precision.HIGHEST)
    energy_new = jnp.max(energy, axis=-1, keepdims=True) - energy
    attention = jax.nn.softmax(energy_new, axis=-1)
    out = jnp.einsum("bcd,bdn->bcn", attention, xf,
                     precision=lax.Precision.HIGHEST).reshape(B, C, H, W)
    return (gamma[0] * out + x.astype(jnp.float32)).astype(x.dtype)


if __name__ == "__main__":
    key = jax.random.PRNGKey(0)
    B, C, H, W = 2, 4, 16, 16
    x = jax.random.normal(key, (B, C, H, W), dtype=jnp.float32)

    # Parameter init per CAM_Module.__init__: gamma = zeros(1) -> output == x.
    gamma0 = jnp.zeros((1,), dtype=jnp.float32)
    out0 = jax.block_until_ready(cam_module_forward(x, gamma0))
    ref0 = cam_module_reference(x, gamma0)
    assert out0.shape == (B, C, H, W)
    assert jnp.allclose(out0, ref0, atol=1e-5, rtol=1e-5), "mismatch (gamma=0)"

    # Non-trivial gamma exercises the attention path (exact softmax divide).
    gamma1 = jnp.array([0.5], dtype=jnp.float32)
    out1 = jax.block_until_ready(cam_module_forward(x, gamma1))
    ref1 = cam_module_reference(x, gamma1)
    assert jnp.allclose(out1, ref1, atol=1e-3, rtol=1e-3), "mismatch (gamma=0.5)"

    # Ragged spatial size (N = 100, not a multiple of 128): fused path, no pad.
    x2 = jax.random.normal(jax.random.PRNGKey(1), (2, 4, 10, 10), jnp.float32)
    out2 = jax.block_until_ready(cam_module_forward(x2, gamma1))
    ref2 = cam_module_reference(x2, gamma1)
    assert jnp.allclose(out2, ref2, atol=1e-3, rtol=1e-3), "mismatch (ragged N)"

    # Batch-folded fused path (bb > 1, grid_b >= 2).
    x3 = jax.random.normal(jax.random.PRNGKey(2), (4, 8, 24, 24), jnp.float32)
    out3 = jax.block_until_ready(cam_module_forward(x3, gamma1))
    ref3 = cam_module_reference(x3, gamma1)
    assert jnp.allclose(out3, ref3, atol=1e-3, rtol=1e-3), "mismatch (bb fold)"

    # Larger C*N exercises the two-pass (gram accumulation + ragged pad) path.
    x4 = jax.random.normal(jax.random.PRNGKey(3), (2, 256, 48, 48), jnp.float32)
    out4 = jax.block_until_ready(cam_module_forward(x4, gamma1))
    ref4 = cam_module_reference(x4, gamma1)
    assert jnp.allclose(out4, ref4, atol=1e-3, rtol=1e-3), "mismatch (two-pass)"

    print("KERNEL_OK")
</pallas_src>

<mosaic_0001>
module attributes {stable_mosaic.version = 11 : i64} {
  func.func @cam_fused_kernel(%arg0: i32, %arg1: memref<1xf32, #tpu.memory_space<smem>>, %arg2: memref<1x4x256xf32, #tpu.memory_space<vmem>>, %arg3: memref<1x4x256xf32, #tpu.memory_space<vmem>>) attributes {dimension_semantics = [#tpu.dimension_semantics<parallel>], iteration_bounds = array<i64: 2>, scalar_prefetch = 0 : i64, scratch_operands = 0 : i64, tpu.core_type = #tpu.core_type<tc>, window_params = [{transform_indices = @transform_0, window_bounds = array<i64: 1>}, {transform_indices = @transform_1, window_bounds = array<i64: 1, 4, 256>}, {transform_indices = @transform_2, window_bounds = array<i64: 1, 4, 256>}]} {
    %c0 = arith.constant 0 : index
    %c0_0 = arith.constant 0 : index
    %c0_1 = arith.constant 0 : index
    %0 = vector.load %arg2[%c0, %c0_0, %c0_1] : memref<1x4x256xf32, #tpu.memory_space<vmem>>, vector<1x4x256xf32>
    %cst = arith.constant dense<0.000000e+00> : vector<1x4x4xf32>
    %1 = tpu.matmul %0, %0, %cst {dimension_numbers = #tpu.dot_dimension_numbers<[2], [2], [1], [1], [0, 0, 0, 1, 1, 1], [0], [0]>} : vector<1x4x256xf32>, vector<1x4x256xf32>, vector<1x4x4xf32> -> vector<1x4x4xf32>
    %cst_2 = arith.constant dense<0x7F800000> : vector<1x4xf32>
    %2 = vector.multi_reduction <minimumf>, %1, %cst_2 [2] : vector<1x4x4xf32> to vector<1x4xf32>
    %3 = vector.shape_cast %2 : vector<1x4xf32> to vector<1x4x1xf32>
    %4 = vector.broadcast %3 : vector<1x4x1xf32> to vector<1x4x4xf32>
    %5 = arith.subf %4, %1 : vector<1x4x4xf32>
    %6 = math.exp %5 : vector<1x4x4xf32>
    %cst_3 = arith.constant dense<0.000000e+00> : vector<1x4xf32>
    %7 = vector.multi_reduction <add>, %6, %cst_3 [2] : vector<1x4x4xf32> to vector<1x4xf32>
    %8 = vector.shape_cast %7 : vector<1x4xf32> to vector<1x4x1xf32>
    %9 = vector.broadcast %8 : vector<1x4x1xf32> to vector<1x4x4xf32>
    %10 = arith.divf %6, %9 : vector<1x4x4xf32>
    %c0_4 = arith.constant 0 : index
    %11 = memref.load %arg1[%c0_4] : memref<1xf32, #tpu.memory_space<smem>>
    %12 = vector.broadcast %11 : f32 to vector<1x4x4xf32>
    %13 = arith.mulf %12, %10 : vector<1x4x4xf32>
    %cst_5 = arith.constant dense<0.000000e+00> : vector<1x4x256xf32>
    %14 = tpu.matmul %13, %0, %cst_5 {dimension_numbers = #tpu.dot_dimension_numbers<[2], [1], [1], [2], [0, 0, 0, 1, 1, 2], [0], [0]>} : vector<1x4x4xf32>, vector<1x4x256xf32>, vector<1x4x256xf32> -> vector<1x4x256xf32>
    %15 = arith.addf %14, %0 : vector<1x4x256xf32>
    %c0_6 = arith.constant 0 : index
    %c0_7 = arith.constant 0 : index
    %c0_8 = arith.constant 0 : index
    %16 = vector.load %arg3[%c0_6, %c0_7, %c0_8] : memref<1x4x256xf32, #tpu.memory_space<vmem>>, vector<1x4x256xf32>
    tpu.vector_store %arg3[%c0_6, %c0_7, %c0_8], %15 {strides = array<i32>} : memref<1x4x256xf32, #tpu.memory_space<vmem>>, vector<1x4x256xf32>,
    return
  }
  func.func @transform_0(%arg0: i32) -> i32 {
    %c0_i32 = arith.constant 0 : i32
    %c0_i32_0 = arith.constant 0 : i32
    return %c0_i32 : i32
  }
  func.func @transform_1(%arg0: i32) -> (i32, i32, i32) {
    %c0_i32 = arith.constant 0 : i32
    %c0_i32_0 = arith.constant 0 : i32
    %c0_i32_1 = arith.constant 0 : i32
    return %arg0, %c0_i32, %c0_i32_0 : i32, i32, i32
  }
  func.func @transform_2(%arg0: i32) -> (i32, i32, i32) {
    %c0_i32 = arith.constant 0 : i32
    %c0_i32_0 = arith.constant 0 : i32
    %c0_i32_1 = arith.constant 0 : i32
    return %arg0, %c0_i32, %c0_i32_0 : i32, i32, i32
  }
}

</mosaic_0001>

<bundles_post_ra>
// kernel: cam_module_forward.1
= control target key start
LH: loop header
LB: loop body
LE: loop exit
PB: predicated region body
PF: predicated region fallthrough
CT: control target
= control target key end

     0   :  { %s398_s11 = smov 0   ;;  %s425_s0 = inlined_call_operand.<no memory space> [shape: f32[1], index: 0, kind: input, shape index: {}]   ;;  %s426_s1 = inlined_call_operand.vmem [shape: f32[2,4,256], index: 1, kind: input, shape index: {}]   ;;  %s427_s2 = inlined_call_operand.vmem [shape: f32[2,4,256], index: 2, kind: output, shape index: {}]  }
   0x1   :  { %7 = sst [smem:[#allocation2]] %s425_s0 }
   0x2 LB: > { %s343_s12 = sadd.s32 4294967295, %s378_s11   ;;  %p347_p0 = scmp.ge.s32.totalorder %s378_s11, 1  ;;  %s378_s11 = sphi %s398_s11, %s13_s11  }
   0x3   : > { %p113_p1 = scmp.lt.s32.totalorder %s378_s11, 3 }
   0x5   : > { %p114_p2 = pnand %p347_p0, %p113_p1 }
   0x6   : > { %p135_p3 = scmp.lt.s32.totalorder (!%p114_p2), %s343_s12, 1  ;;  %s222_s16 = sld [smem:[#allocation2]] (!%p114_p2) }
   0x7   : > { %117 = sbr.rel (%p114_p2) target bundleno = 567 (0x237), region = 28 }
   0xc   : > { %s429_s12 = smov (!%p135_p3, %s343_s12), 1  ;;  %vm197_vm0 = vcmask 27648   ;;  %vm237_vm1 = vcmask 1043456   ;;  %v223_v27 = vstv %s222_s16  ;;  %vm233_vm6 = vcmask 31744  }
   0xd   : > { %s358_s0 = sshll.u32 %s429_s12, 3 }
   0xe   : > { %s139_s15 = scalar_lea.vmem %s426_s1, %s358_s0  ;;  %s144_s19 = scalar_lea.vmem %s427_s2, %s358_s0 }
   0xf   : > { %v145_v0 = vld [vmem:[%s139_s15] sm:$0xff] }
  0x10   : > { %147 = vst [vmem:[#allocation1] ss:$2 sm:$0xff] %v145_v0 }
  0x17   : > { %v148_v1 = vld.sshfl [vmem:[#allocation1] sm:$0xff pattern:$0x75316420]  ;;  %v149_v2 = vld.sshfl [vmem:[#allocation1 + $0x8] sm:$0xff pattern:$0x75316420] }
  0x18   : > { %152 = vst [vmem:[#allocation1] ss:$2 sm:$0xff] %v145_v0 }
  0x1f   : > { %v153_v3 = vld.sshfl [vmem:[#allocation1] sm:$0xff pattern:$0x75316420]  ;;  %v154_v4 = vld.sshfl [vmem:[#allocation1 + $0x8] sm:$0xff pattern:$0x75316420] }
  0x20   : > { %172 = vmatpush.xpose.msra.mxu0 %v153_v3  ;;  %192 = vmatpush.xpose.msra.mxu1 %v154_v4  ;;  %225 = vst [vmem:[#allocation1] ss:$2 sm:$0xff] %v145_v0 }
  0x23   : > { %173 = vmatmul.f32.vlgmr.msra.gmra.mxu0 %v148_v1  ;;  %193 = vmatmul.f32.vlgmr.msra.gmra.mxu1 %v149_v2 }
  0x27   : > { %v226_v14 = vld.sshfl [vmem:[#allocation1] sm:$0xff pattern:$0x75316420]  ;;  %v227_v15 = vld.sshfl [vmem:[#allocation1 + $0x8] sm:$0xff pattern:$0x75316420] }
  0x28   : > { %352 = vmatpush.msk.msra.mxu2 %vm237_vm1, %v226_v14  ;;  %228 = vst [vmem:[#allocation1] ss:$2 sm:$0xff] %v145_v0  ;;  %354 = vmatpush.msk.msra.mxu3 %vm237_vm1, %v227_v15 }
  0x2f   : > { %v230_v30 = vld.sshfl [vmem:[#allocation1 + $0x8] sm:$0xff pattern:$0x75316420]  ;;  %v229_v31 = vld.sshfl [vmem:[#allocation1] sm:$0xff pattern:$0x75316420] }
  0xa0   : > { %v174_v5 = vpop.f32.mrf.mxu0  ;;  %v194_v6 = vpop.f32.mrf.mxu1 }
  0xa1   : > { %v195_v7 = vadd.f32 %v194_v6, %v174_v5 }
  0xa3   : > { %v198_v8 = vsel %vm197_vm0, %v195_v7, inf }
  0xa4   : > { %199 = vmin.xlane.f32.xlu0 %v198_v8 }
 0x117   : > { %v200_v9 = vpop.xlane.xlu0 %199 }
 0x118   : > { %v201_v10 = vsub.f32 %v200_v9, %v195_v7 }
 0x11a   : > { %v202_v11 = vmul.f32 1.442695, %v201_v10 }
 0x11c   : > { %368 = vpow2.f32 %v202_v11 }
 0x122   : > { %v369_v12 = vpop.eup %368 }
 0x123   : > { %v204_v13 = vsel %vm197_vm0, %v369_v12, 0.0 }
 0x124   : > { %205 = vadd.xlane.f32.xlu0 %v204_v13 }
 0x197   : > { %v206_v16 = vpop.xlane.xlu0 %205 }
 0x198   : > { %370 = vrcp.f32 %v206_v16  ;;  %v218_v20 = vand.u32 2147483648, %v206_v16  ;;  %v216_v22 = vand.u32 2147483647, %v206_v16  ;;  %vm212_vm3 = vweird.f32 %v206_v16 }
 0x19a   : > { %v219_v24 = vor.u32 1.1754944e-38, %v218_v20  ;;  %vm217_vm5 = vcmp.eq.f32.partialorder %v216_v22, 8.507059e+37 }
 0x19e   : > { %v371_v17 = vpop.eup %370 }
 0x19f   : > { %v208_v18 = vmul.f32 %v371_v17, %v206_v16  ;;  %vm213_vm2 = vweird.f32 %v371_v17 }
 0x1a0   : > { %vm214_vm4 = vmor %vm212_vm3, %vm213_vm2 }
 0x1a1   : > { %v209_v19 = vsub.f32 1.0, %v208_v18 }
 0x1a3   : > { %v210_v21 = vmul.f32 %v371_v17, %v209_v19 }
 0x1a5   : > { %v211_v23 = vadd.f32 %v371_v17, %v210_v21 }
 0x1a7   : > { %v215_v25 = vsel %vm214_vm4, %v371_v17, %v211_v23 }
 0x1a8   : > { %v220_v26 = vsel %vm217_vm5, %v219_v24, %v215_v25 }
 0x1a9   : > { %v221_v28 = vmul.f32 %v369_v12, %v220_v26 }
 0x1ab   : > { %v224_v29 = vmul.f32 %v223_v27, %v221_v28 }
 0x1ad   : > { %353 = vmatmul.msk.f32.vlgmr.msra.gmra.mxu2 %vm233_vm6, %v224_v29  ;;  %355 = vmatmul.msk.f32.vlgmr.msra.gmra.mxu3 %vm233_vm6, %v224_v29 }
 0x230   : > { %v259_v32 = vpop.f32.mrf.mxu2  ;;  %v279_v33 = vpop.f32.mrf.mxu3 }
 0x231   : > { %v280_v34 = vadd.f32 %v279_v33, %v230_v30  ;;  %v260_v35 = vadd.f32 %v259_v32, %v229_v31 }
 0x233   : > { %v284_v36 = vrot.slane %v280_v34, 4 }
 0x235   : > { %v285_v37 = vsel %vm237_vm1, %v260_v35, %v284_v36 }
 0x236   : > { %287 = vst [vmem:[%s144_s19] sm:$0xff] %v285_v37 }
 0x237 PF: > { %s13_s11 = sadd.s32 1, %s378_s11  }
 0x238   : > { %p10_p4 = scmp.ge.s32.totalorder %s13_s11, 4  }
 0x23a   :  { %12 = sbr.rel (!%p10_p4) target bundleno = 2 (0x2), region = 58 }

</bundles_post_ra>
